<compile_context>
chip_gen: v7x
topology: tpu7x:2x2x1
jax: 0.10.0
libtpu: 0.0.40
codegen_flags: <defaults>
</compile_context>

<pallas_src>
import functools

import jax
import jax.numpy as jnp
from jax.experimental import pallas as pl
from jax.experimental.pallas import tpu as pltpu

# ---- MolwiseLoss default configuration (from __init__) ----------------------
GRADIENT_WEIGHT = 0.8
ENERGY_WEIGHT = 1.0
PARAM_WEIGHT = 0.001
TUPLEWISE_WEIGHT = 0.0
WEIGHTS = {"n2_k": 0.001, "n3_k": 0.01, "n4_k": 0.0001}
PROPER_REGULARISATION = 0.0     # default 0.0 -> branch skipped, as in torch
IMPROPER_REGULARISATION = 0.0   # default 0.0 -> branch skipped, as in torch
TERMS = ["n2", "n3", "n4"]


def _round_up(x, m):
    return (x + m - 1) // m * m


def correct_torsion_shape(x, shape1):
    """JAX port of the torch helper (operates on dim 1 of a 2-D tensor)."""
    if x.shape[1] < shape1:
        pad = jnp.zeros_like(x[:, : shape1 - x.shape[1]])
        return jnp.concatenate([x, pad], axis=1)
    elif x.shape[1] > shape1:
        return x[:, :shape1]
    return x


# ---- Pallas kernel: TM molecules per grid step, fused weighted sum-of-squares
def _molwise_loss_kernel(x_ref, xr_ref, w_ref, out_ref, acc_ref, *,
                         param_start, param_end):
    b = pl.program_id(1)
    nb = pl.num_programs(1)

    @pl.when(b == 0)
    def _():
        acc_ref[...] = jnp.zeros_like(acc_ref)

    x = x_ref[...]          # (TM, N_pad) f32
    xr = xr_ref[...]        # (TM, N_pad) f32
    w = w_ref[...]          # (1,  N_pad) f32, grid-invariant (resident block)

    # NaN masking is only legal on the parameter lanes (matches torch module).
    lane = jax.lax.broadcasted_iota(jnp.int32, x.shape, 1)
    is_param = (lane >= param_start) & (lane < param_end)
    d = jnp.where(jnp.isnan(xr) & is_param, 0.0, x - xr)

    # All term weights / fac^2 / mean denominators are pre-folded into w.
    acc_ref[...] = acc_ref[...] + jnp.sum(w * d * d)

    @pl.when(b == nb - 1)
    def _():
        # one (8,128)-aligned partial-sum block per core
        out_ref[...] = jnp.broadcast_to(acc_ref[...], out_ref.shape)


# ---- wrapper: packing / weight construction in plain JAX ---------------------
def molwise_loss(energies, energies_ref, gradients, gradients_ref, params, params_ref):
    f32 = jnp.float32
    M = energies.shape[0]

    E = energies.reshape(M, -1).astype(f32)
    Er = energies_ref.reshape(M, -1).astype(f32)
    G = gradients.reshape(M, -1).astype(f32)
    Gr = gradients_ref.reshape(M, -1).astype(f32)

    p_chunks, pr_chunks, fac_counts = [], [], []
    for k in params_ref.keys():
        if "improper" in k:           # impropers are excluded from the param loss
            continue
        fac = WEIGHTS.get(k, 1.0)
        these = params[k]
        these_ref = params_ref[k]
        if k == "n4_k":
            # apply the 2-D torch helper per molecule
            these_ref = jax.vmap(
                lambda x: correct_torsion_shape(x, these.shape[-1])
            )(these_ref)
        these_f = these.reshape(M, -1).astype(f32)
        these_ref_f = these_ref.reshape(M, -1).astype(f32)
        p_chunks.append(these_f)
        pr_chunks.append(these_ref_f)
        fac_counts.append((fac, these_f.shape[1]))

    P = jnp.concatenate(p_chunks, axis=1)
    Pr = jnp.concatenate(pr_chunks, axis=1)

    ne, ng, npar = E.shape[1], G.shape[1], P.shape[1]
    n_tot = ne + ng + npar
    N_pad = _round_up(n_tot, 128)

    # Effective per-element weights: term_weight * fac^2 / element_count.
    w_parts = [jnp.full((ne,), ENERGY_WEIGHT / ne, f32),
               jnp.full((ng,), GRADIENT_WEIGHT / ng, f32)]
    for fac, cnt in fac_counts:
        w_parts.append(jnp.full((cnt,), PARAM_WEIGHT * (fac * fac) / npar, f32))
    if N_pad > n_tot:
        w_parts.append(jnp.zeros((N_pad - n_tot,), f32))
    W = jnp.concatenate(w_parts).reshape(1, N_pad)

    # One lane-dense slab per molecule: energies | gradients | params | pad.
    X = jnp.concatenate([E, G, P], axis=1)
    Xr = jnp.concatenate([Er, Gr, Pr], axis=1)

    # Row batching + 2-way core split (v7x megacore; harmless on 1-TC chips).
    NC = 2
    rows_per_core = -(-M // NC)
    TM = min(256, _round_up(max(rows_per_core, 1), 8))   # sublane-dense, VMEM-safe
    rows_per_core = _round_up(rows_per_core, TM)
    NB = rows_per_core // TM
    M_pad = NC * rows_per_core

    X = jnp.pad(X, ((0, M_pad - M), (0, N_pad - n_tot)))      # zero rows/lanes
    Xr = jnp.pad(Xr, ((0, M_pad - M), (0, N_pad - n_tot)))    # contribute 0 loss

    kernel = functools.partial(_molwise_loss_kernel,
                               param_start=ne + ng,
                               param_end=ne + ng + npar)

    partials = pl.pallas_call(
        kernel,
        out_shape=jax.ShapeDtypeStruct((NC, 8, 128), f32),
        grid_spec=pltpu.PrefetchScalarGridSpec(
            num_scalar_prefetch=0,
            grid=(NC, NB),
            in_specs=[
                pl.BlockSpec((TM, N_pad), lambda c, b: (c * NB + b, 0)),
                pl.BlockSpec((TM, N_pad), lambda c, b: (c * NB + b, 0)),
                pl.BlockSpec((1, N_pad), lambda c, b: (0, 0)),   # shared weights
            ],
            out_specs=pl.BlockSpec((1, 8, 128), lambda c, b: (c, 0, 0)),
            scratch_shapes=[pltpu.VMEM((1, 1), f32)],
        ),
        compiler_params=pltpu.CompilerParams(
            dimension_semantics=("parallel", "arbitrary")),
    )(X, Xr, W)

    # single division by the true molecule count (no per-step /M rounding)
    return jnp.sum(partials[:, 0, 0]) / M


# ---- pure-JAX reference (mirrors the torch per-graph loop) --------------------
def reference_loss(energies, energies_ref, gradients, gradients_ref, params, params_ref):
    M = energies.shape[0]
    total = jnp.float32(0.0)
    for m in range(M):
        loss_term = jnp.float32(0.0)
        loss_term += ENERGY_WEIGHT * jnp.mean(
            jnp.square(energies[m] - energies_ref[m]))
        loss_term += GRADIENT_WEIGHT * jnp.mean(
            jnp.square(gradients[m] - gradients_ref[m]))
        p_list, pr_list = [], []
        for k in params_ref.keys():
            if "improper" in k:
                continue
            fac = WEIGHTS.get(k, 1.0)
            tp = params[k][m]
            tpr = params_ref[k][m]
            if k == "n4_k":
                tpr = correct_torsion_shape(tpr, tp.shape[1])
            nanmask = jnp.isnan(tpr)
            tp = jnp.where(nanmask, jnp.zeros_like(tp), tp)
            tpr = jnp.where(nanmask, jnp.zeros_like(tpr), tpr)
            p_list.append(tp.flatten() * fac)
            pr_list.append(tpr.flatten() * fac)
        pt = jnp.concatenate(p_list)
        prt = jnp.concatenate(pr_list)
        loss_term += PARAM_WEIGHT * jnp.mean(jnp.square(pt - prt))
        total += loss_term / M
    return total


if __name__ == "__main__":
    key = jax.random.PRNGKey(0)
    M, n_conf, n_atoms = 2, 8, 16
    n_bonds, n_angles, n_propers, n_period = 32, 48, 24, 6

    ks = jax.random.split(key, 16)
    energies = jax.random.normal(ks[0], (M, n_conf), jnp.float32)
    energies_ref = jax.random.normal(ks[1], (M, n_conf), jnp.float32)
    gradients = jax.random.normal(ks[2], (M, n_atoms, n_conf, 3), jnp.float32)
    gradients_ref = jax.random.normal(ks[3], (M, n_atoms, n_conf, 3), jnp.float32)

    params = {
        "n2_k": jax.random.normal(ks[4], (M, n_bonds), jnp.float32),
        "n2_eq": jax.random.normal(ks[5], (M, n_bonds), jnp.float32),
        "n3_k": jax.random.normal(ks[6], (M, n_angles), jnp.float32),
        "n3_eq": jax.random.normal(ks[7], (M, n_angles), jnp.float32),
        "n4_k": jax.random.normal(ks[8], (M, n_propers, n_period), jnp.float32),
        "n4_improper_k": jax.random.normal(ks[9], (M, 8, 3), jnp.float32),
    }
    # reference n4_k has a different periodicity (4) -> exercises correct_torsion_shape
    n3_k_ref = jax.random.normal(ks[12], (M, n_angles), jnp.float32)
    # inject NaNs to exercise the nan-masking path
    n3_k_ref = n3_k_ref.at[:, ::7].set(jnp.nan)
    params_ref = {
        "n2_k": jax.random.normal(ks[10], (M, n_bonds), jnp.float32),
        "n2_eq": jax.random.normal(ks[11], (M, n_bonds), jnp.float32),
        "n3_k": n3_k_ref,
        "n3_eq": jax.random.normal(ks[13], (M, n_angles), jnp.float32),
        "n4_k": jax.random.normal(ks[14], (M, n_propers, 4), jnp.float32),
        "n4_improper_k": jax.random.normal(ks[15], (M, 8, 3), jnp.float32),
    }

    out = molwise_loss(energies, energies_ref, gradients, gradients_ref,
                       params, params_ref)
    out = jax.block_until_ready(out)

    ref = reference_loss(energies, energies_ref, gradients, gradients_ref,
                         params, params_ref)

    if not jnp.allclose(out, ref, rtol=1e-5, atol=1e-6):
        raise AssertionError(f"mismatch: pallas={out} ref={ref}")
    print("KERNEL_OK")
</pallas_src>

<mosaic_0001>
module attributes {stable_mosaic.version = 11 : i64} {
  func.func @_molwise_loss_kernel(%arg0: i32, %arg1: i32, %arg2: memref<8x768xf32, #tpu.memory_space<vmem>>, %arg3: memref<8x768xf32, #tpu.memory_space<vmem>>, %arg4: memref<1x768xf32, #tpu.memory_space<vmem>>, %arg5: memref<1x8x128xf32, #tpu.memory_space<vmem>>, %arg6: memref<1x1xf32, #tpu.memory_space<vmem>>) attributes {dimension_semantics = [#tpu.dimension_semantics<parallel>, #tpu.dimension_semantics<arbitrary>], iteration_bounds = array<i64: 2, 1>, scalar_prefetch = 0 : i64, scratch_operands = 1 : i64, tpu.core_type = #tpu.core_type<tc>, window_params = [{transform_indices = @transform_0, window_bounds = array<i64: 8, 768>}, {transform_indices = @transform_1, window_bounds = array<i64: 8, 768>}, {pipeline_mode = #tpu.pipeline_mode<synchronous>, transform_indices = @transform_2, window_bounds = array<i64: 1, 768>}, {transform_indices = @transform_3, window_bounds = array<i64: 1, 8, 128>}]} {
    %c0_i32 = arith.constant 0 : i32
    %0 = arith.cmpi eq, %arg1, %c0_i32 : i32
    %1 = arith.extui %0 : i1 to i32
    %c0_i32_0 = arith.constant 0 : i32
    %2 = arith.cmpi ne, %1, %c0_i32_0 : i32
    scf.if %2 {
      %cst_13 = arith.constant 0.000000e+00 : f32
      %31 = vector.broadcast %cst_13 : f32 to vector<1x1xf32>
      %c0_14 = arith.constant 0 : index
      %c0_15 = arith.constant 0 : index
      %32 = vector.load %arg6[%c0_14, %c0_15] : memref<1x1xf32, #tpu.memory_space<vmem>>, vector<1x1xf32>
      tpu.vector_store %arg6[%c0_14, %c0_15], %31 {strides = array<i32>} : memref<1x1xf32, #tpu.memory_space<vmem>>, vector<1x1xf32>,
    } else {
    }
    %c0 = arith.constant 0 : index
    %c0_1 = arith.constant 0 : index
    %3 = vector.load %arg2[%c0, %c0_1] : memref<8x768xf32, #tpu.memory_space<vmem>>, vector<8x768xf32>
    %c0_2 = arith.constant 0 : index
    %c0_3 = arith.constant 0 : index
    %4 = vector.load %arg3[%c0_2, %c0_3] : memref<8x768xf32, #tpu.memory_space<vmem>>, vector<8x768xf32>
    %c0_4 = arith.constant 0 : index
    %c0_5 = arith.constant 0 : index
    %5 = vector.load %arg4[%c0_4, %c0_5] : memref<1x768xf32, #tpu.memory_space<vmem>>, vector<1x768xf32>
    %6 = tpu.iota {dimensions = array<i32: 1>} : vector<8x768xi32>
    %c392_i32 = arith.constant 392 : i32
    %7 = vector.broadcast %c392_i32 : i32 to vector<8x768xi32>
    %8 = arith.cmpi sge, %6, %7 : vector<8x768xi32>
    %c696_i32 = arith.constant 696 : i32
    %9 = vector.broadcast %c696_i32 : i32 to vector<8x768xi32>
    %10 = arith.cmpi slt, %6, %9 : vector<8x768xi32>
    %11 = arith.andi %8, %10 : vector<8x768xi1>
    %12 = arith.cmpf one, %4, %4 : vector<8x768xf32>
    %13 = arith.andi %12, %11 : vector<8x768xi1>
    %14 = arith.subf %3, %4 : vector<8x768xf32>
    %cst = arith.constant 0.000000e+00 : f32
    %15 = vector.broadcast %cst : f32 to vector<8x768xf32>
    %16 = arith.select %13, %15, %14 : vector<8x768xi1>, vector<8x768xf32>
    %c0_6 = arith.constant 0 : index
    %c0_7 = arith.constant 0 : index
    %17 = vector.load %arg6[%c0_6, %c0_7] : memref<1x1xf32, #tpu.memory_space<vmem>>, vector<1x1xf32>
    %18 = vector.broadcast %5 : vector<1x768xf32> to vector<8x768xf32>
    %19 = arith.mulf %18, %16 : vector<8x768xf32>
    %20 = arith.mulf %19, %16 : vector<8x768xf32>
    %21 = vector.shape_cast %20 : vector<8x768xf32> to vector<1x8x768xf32>
    %cst_8 = arith.constant dense<0.000000e+00> : vector<1xf32>
    %22 = vector.multi_reduction <add>, %21, %cst_8 [1, 2] : vector<1x8x768xf32> to vector<1xf32>
    %23 = vector.shape_cast %22 : vector<1xf32> to vector<1x1x1xf32>
    %24 = vector.extract %23[0, 0, 0] : f32 from vector<1x1x1xf32>
    %25 = vector.broadcast %24 : f32 to vector<1x1xf32>
    %26 = arith.addf %17, %25 : vector<1x1xf32>
    %c0_9 = arith.constant 0 : index
    %c0_10 = arith.constant 0 : index
    %27 = vector.load %arg6[%c0_9, %c0_10] : memref<1x1xf32, #tpu.memory_space<vmem>>, vector<1x1xf32>
    tpu.vector_store %arg6[%c0_9, %c0_10], %26 {strides = array<i32>} : memref<1x1xf32, #tpu.memory_space<vmem>>, vector<1x1xf32>,
    %c0_i32_11 = arith.constant 0 : i32
    %28 = arith.cmpi eq, %arg1, %c0_i32_11 : i32
    %29 = arith.extui %28 : i1 to i32
    %c0_i32_12 = arith.constant 0 : i32
    %30 = arith.cmpi ne, %29, %c0_i32_12 : i32
    scf.if %30 {
      %c0_13 = arith.constant 0 : index
      %c0_14 = arith.constant 0 : index
      %31 = vector.load %arg6[%c0_13, %c0_14] : memref<1x1xf32, #tpu.memory_space<vmem>>, vector<1x1xf32>
      %32 = vector.shape_cast %31 : vector<1x1xf32> to vector<1x1x1xf32>
      %33 = vector.broadcast %32 : vector<1x1x1xf32> to vector<1x8x128xf32>
      %c0_15 = arith.constant 0 : index
      %c0_16 = arith.constant 0 : index
      %c0_17 = arith.constant 0 : index
      %34 = vector.load %arg5[%c0_15, %c0_16, %c0_17] : memref<1x8x128xf32, #tpu.memory_space<vmem>>, vector<1x8x128xf32>
      tpu.vector_store %arg5[%c0_15, %c0_16, %c0_17], %33 {strides = array<i32>} : memref<1x8x128xf32, #tpu.memory_space<vmem>>, vector<1x8x128xf32>,
    } else {
    }
    return
  }
  func.func @transform_0(%arg0: i32, %arg1: i32) -> (i32, i32) {
    %c1_i32 = arith.constant 1 : i32
    %0 = arith.muli %arg0, %c1_i32 : i32
    %1 = arith.addi %0, %arg1 : i32
    %c0_i32 = arith.constant 0 : i32
    %c0_i32_0 = arith.constant 0 : i32
    return %1, %c0_i32 : i32, i32
  }
  func.func @transform_1(%arg0: i32, %arg1: i32) -> (i32, i32) {
    %c1_i32 = arith.constant 1 : i32
    %0 = arith.muli %arg0, %c1_i32 : i32
    %1 = arith.addi %0, %arg1 : i32
    %c0_i32 = arith.constant 0 : i32
    %c0_i32_0 = arith.constant 0 : i32
    return %1, %c0_i32 : i32, i32
  }
  func.func @transform_2(%arg0: i32, %arg1: i32) -> (i32, i32) {
    %c0_i32 = arith.constant 0 : i32
    %c0_i32_0 = arith.constant 0 : i32
    %c0_i32_1 = arith.constant 0 : i32
    return %c0_i32, %c0_i32_0 : i32, i32
  }
  func.func @transform_3(%arg0: i32, %arg1: i32) -> (i32, i32, i32) {
    %c0_i32 = arith.constant 0 : i32
    %c0_i32_0 = arith.constant 0 : i32
    %c0_i32_1 = arith.constant 0 : i32
    return %arg0, %c0_i32, %c0_i32_0 : i32, i32, i32
  }
}

</mosaic_0001>

<bundles_post_ra>
// kernel: tpu_custom_call.1
= control target key start
LH: loop header
LB: loop body
LE: loop exit
PB: predicated region body
PF: predicated region fallthrough
CT: control target
= control target key end

     0   :  { %8 = vsyncpa [#allocation4], 0  ;;  %s994_s0 = inlined_call_operand.hbm [shape: f32[16,768], index: 0, kind: input, shape index: {}]   ;;  %s995_s1 = inlined_call_operand.hbm [shape: f32[16,768], index: 1, kind: input, shape index: {}]   ;;  %s996_s2 = inlined_call_operand.vmem [shape: f32[1,768], index: 2, kind: input, shape index: {}]   ;;  %s997_s3 = inlined_call_operand.hbm [shape: f32[2,8,128], index: 3, kind: output, shape index: {}]  }
   0x1   :  { %10 = vsyncpa [#allocation4 + $0x1], 0 }
   0x2   :  { %11 = vsyncpa [#allocation7], 0 }
   0x3   :  { %13 = vsyncpa [#allocation7 + $0x1], 0 }
   0x4   :  { %14 = vsyncpa [#allocation5], 0 }
   0x5   :  { %16 = vsyncpa [#allocation5 + $0x1], 0  ;;  %s769_s12 = smov 0   ;;  %s771_s13 = smov 0  }
   0x6   :  { %s773_s14 = smov 0   ;;  %s775_s15 = smov 0  }
   0x7   :  { %s777_s16 = smov 0   ;;  %s779_s17 = smov 0  }
   0x8 LB: > { %s506_s18 = sadd.s32 4294967295, %s742_s17   ;;  %s507_s19 = sadd.s32 4294967294, %s742_s17   ;;  %s742_s17 = sphi %s779_s17, %s22_s17   ;;  %s738_s16 = sphi %s777_s16, %s1016_s16   ;;  %s734_s15 = sphi %s775_s15, %s1015_s15   ;;  %s730_s14 = sphi %s773_s14, %s1014_s14   ;;  %s726_s13 = sphi %s771_s13, %s1013_s13   ;;  %s722_s12 = sphi %s769_s12, %s1012_s12  }
   0x9   : > { %s34_s20 = sadd.s32 1, %s738_s16  ;;  %s43_s21 = sadd.s32 1, %s730_s14 }
   0xa   : > { %p36_p0 = scmp.ge.s32.totalorder %s34_s20, 2  ;;  %p50_p1 = scmp.ne.s32.totalorder %s730_s14, %s726_s13 }
   0xb   : > { %p51_p2 = scmp.eq.s32.totalorder %s742_s17, 0  ;;  %p56_p3 = scmp.ne.s32.totalorder %s726_s13, %s722_s12 }
   0xc   : > { %s1018_s20 = smov (%p36_p0, %s34_s20), 0  ;;  %p57_p5 = scmp.eq.s32.totalorder %s506_s18, 0 }
   0xd   : > { %p810_p4 = por %p51_p2, %p50_p1  ;;  %s40_s23 = ssub.s32 %s738_s16, %s1018_s20 }
   0xe   : > { %p129_p6 = scmp.eq.s32.totalorder %s506_s18, 1  ;;  %p41_p7 = scmp.eq.s32.totalorder %s40_s23, 0 }
   0xf   : > { %p816_p8 = por %p57_p5, %p56_p3  ;;  %p135_p10 = scmp.eq.s32.totalorder %s507_s19, 1 }
  0x10   : > { %p820_p9 = por %p129_p6, %p50_p1  ;;  %p543_p13 = scmp.lt.s32.totalorder %s742_s17, 2 }
  0x11   : > { %s1001_s24 = scalar_select %p816_p8, 1, 0 }
  0x12   : > { %s1002_s25 = scalar_select %p820_p9, 1, 0 }
  0x13   : > { %s825_s26 = scalar_select %p41_p7, %s730_s14, %s43_s21  }
  0x14   : > { %p827_p11 = por %p135_p10, %p56_p3  ;;  %s834_s28 = sand.u32 1, %s730_s14  }
  0x15   : > { %s519_s29 = smul.u32 48, %s834_s28  ;;  %p840_p0 = pnand %p543_p13, %p810_p4 }
  0x16   : > { %s1003_s27 = scalar_select %p827_p11, 1, 0 }
  0x17   : > { %s520_s30 = smul.u32 768, %s738_s16  ;;  %s162_s8 = scalar_lea.vmem [#allocation3], %s519_s29 }
  0x18   : > { %s171_s9 = sshll.u32 %s162_s8, 4  ;;  %s159_s10 = scalar_lea.sflag [#allocation4], %s834_s28  ;;  %s854_s9 = int_to_ptr.vmem [resolvable:$true] %s171_s9 }
  0x19   : > { %s850_s7 = scalar_lea.hbm %s994_s0, %s520_s30  ;;  %p598_p3 = pneg %p840_p0 }
  0x1a   : > { %s596_s11 = scalar_lea.hbm %s850_s7, 768  ;;  %s601_s21 = scalar_lea.hbm %s994_s0, 1536 }
  0x1b   : > { %p597_p2 = scmp.ne.s32.totalorder %s850_s7, %s596_s11  ;;  %p602_p6 = scmp.lt.u32.totalorder %s850_s7, %s994_s0 }
  0x1c   : > { %p603_p7 = scmp.lt.u32.totalorder %s601_s21, %s596_s11  ;;  %p605_p13 = scmp.lt.u32.totalorder %s596_s11, %s850_s7 }
  0x1d   : > { %p599_p4 = pnand %p598_p3, %p597_p2 }
  0x1e   : > { %p604_p10 = por %p603_p7, %p602_p6 }
  0x1f   : > { %p600_p5 = pneg %p599_p4 }
  0x20   : > { %p606_p12 = por %p605_p13, %p604_p10 }
  0x22   : > { %p607_p1 = pnand %p606_p12, %p600_p5 }
  0x24   : > { %610 = shalt.err (!%p607_p1)
}
  0x25   : > { %s611_s5 = scalar_lea.vmem %s854_s9, 768  ;;  %s744_s6 = smov [#allocation3]  }
  0x26   : > { %p612_p2 = scmp.ne.s32.totalorder %s854_s9, %s611_s5  ;;  %s616_s8 = sshll.u32 %s744_s6, 4  ;;  %s617_s8 = int_to_ptr.vmem [resolvable:$false] %s616_s8 }
  0x27   : > { %s618_s18 = scalar_lea.vmem %s617_s8, 1536  ;;  %p619_p9 = scmp.lt.s32.totalorder %s854_s9, %s617_s8 }
  0x28   : > { %p614_p4 = pnand %p612_p2, %p598_p3  ;;  %p620_p6 = scmp.lt.s32.totalorder %s618_s18, %s611_s5 }
  0x2a   : > { %p615_p11 = pneg %p614_p4  ;;  %p621_p7 = por %p620_p6, %p619_p9 }
  0x2c   : > { %p622_p10 = pnand %p621_p7, %p615_p11 }
  0x2e   : > { %625 = shalt.err (!%p622_p10)
}
  0x2f   : > { %535 = dma.hbm_to_vmem [thread:$0]  (!%p840_p0), %s850_s7, 768, %s854_s9, %s159_s10  }
  0x30   : > { %p196_p12 = scmp.lt.s32.totalorder %s742_s17, 3  ;;  %s888_s21 = scalar_lea.hbm %s995_s1, %s520_s30 }
  0x31   : > { %p1005_p9 = scmp.ge.s32.totalorder %s742_s17, 1  ;;  %s182_s23 = scalar_lea.vmem [#allocation6], %s519_s29 }
  0x32   : > { %s191_s5 = sshll.u32 %s182_s23, 4  ;;  %s179_s7 = scalar_lea.sflag [#allocation7], %s834_s28  ;;  %s192_s5 = int_to_ptr.vmem [resolvable:$true] %s191_s5 }
  0x33   : > { %p892_p11 = pnand %p1005_p9, %p196_p12  ;;  %s626_s9 = scalar_lea.hbm %s888_s21, 768 }
  0x34   : > { %p627_p1 = scmp.ne.s32.totalorder %s888_s21, %s626_s9  ;;  %s631_s6 = scalar_lea.hbm %s995_s1, 1536 }
  0x35   : > { %s1006_s22 = scalar_select %p892_p11, 1, 0 }
  0x36   : > { %p629_p5 = pnand %p627_p1, %p598_p3  ;;  %p632_p2 = scmp.lt.u32.totalorder %s888_s21, %s995_s1 }
  0x37   : > { %p633_p4 = scmp.lt.u32.totalorder %s631_s6, %s626_s9  ;;  %p635_p7 = scmp.lt.u32.totalorder %s626_s9, %s888_s21 }
  0x38   : > { %p630_p13 = pneg %p629_p5 }
  0x39   : > { %p634_p6 = por %p633_p4, %p632_p2 }
  0x3b   : > { %p636_p10 = por %p635_p7, %p634_p6 }
  0x3d   : > { %p637_p12 = pnand %p636_p10, %p630_p13 }
  0x3f   : > { %640 = shalt.err (!%p637_p12)
}
  0x40   : > { %s641_s28 = scalar_lea.vmem %s192_s5, 768  ;;  %s745_s29 = smov [#allocation6]  }
  0x41   : > { %p642_p9 = scmp.ne.s32.totalorder %s192_s5, %s641_s28  ;;  %s646_s11 = sshll.u32 %s745_s29, 4  ;;  %s647_s11 = int_to_ptr.vmem [resolvable:$false] %s646_s11 }
  0x42   : > { %s648_s19 = scalar_lea.vmem %s647_s11, 1536  ;;  %p649_p8 = scmp.lt.s32.totalorder %s192_s5, %s647_s11 }
  0x43   : > { %p644_p1 = pnand %p642_p9, %p598_p3  ;;  %p650_p11 = scmp.lt.s32.totalorder %s648_s19, %s641_s28 }
  0x45   : > { %p645_p5 = pneg %p644_p1  ;;  %p651_p2 = por %p650_p11, %p649_p8 }
  0x47   : > { %p652_p4 = pnand %p651_p2, %p645_p5 }
  0x49   : > { %655 = shalt.err (!%p652_p4)
}
  0x4a   : > { %538 = dma.hbm_to_vmem [thread:$0]  (!%p840_p0), %s888_s21, 768, %s192_s5, %s179_s7  }
  0x4b   : > { %p1007_p13 = scmp.ne.s32.totalorder %s1006_s22, 0 }
  0x4c   : > { %s921_s23 = sand.u32 (!%p1007_p13), 1, %s726_s13   ;;  %p1008_p3 = scmp.ne.s32.totalorder (!%p1007_p13), %s1001_s24, 0 }
  0x4d   : > { %200 = sbr.rel (%p1007_p13) target bundleno = 468 (0x1d4), region = 32  ;;  %s203_s30 = scalar_lea.sflag (!%p1007_p13), [#allocation4], %s921_s23 }
  0x4e   : > { %s523_s9 = smul.u32 (!%p1007_p13), 48, %s921_s23 }
  0x50   : > { %s206_s10 = scalar_lea.vmem (!%p1007_p13), [#allocation3], %s523_s9 }
  0x54   : > { %709 = dma.done.wait (%p1008_p3), %s203_s30, 768  }
  0x55   : > { %711 = vsyncadd (%p1008_p3), %s203_s30, 4294966528  ;;  %s212_s4 = scalar_lea.sflag [#allocation7], %s921_s23  ;;  %s215_s21 = scalar_lea.vmem [#allocation6], %s523_s9 }
  0x56   : > { %713 = dma.done.wait (%p1008_p3), %s212_s4, 768  }
  0x57   : > { %715 = vsyncadd (%p1008_p3), %s212_s4, 4294966528  ;;  %v264_v0 = vlaneseq  ;;  %v251_v5 = vld [vmem:[%s206_s10] sm:$0xff]  ;;  %v252_v6 = vld [vmem:[%s206_s10 + $0x8] sm:$0xff]  ;;  %vm249_vm7 = vcmask 0   ;;  %v746_v56 = vmov 0.0   ;;  %v747_v57 = vmov 0  }
  0x58   : > { %v253_v7 = vld [vmem:[%s206_s10 + $0x10] sm:$0xff]  ;;  %v254_v9 = vld [vmem:[%s206_s10 + $0x18] sm:$0xff]  ;;  %v255_v10 = vld [vmem:[%s206_s10 + $0x20] sm:$0xff]  ;;  %250 = vst.msk [vmem:[#allocation2] sm:$0x1] %vm249_vm7, %v746_v56  ;;  %595 = vset.pattern.permute.xlu0 %v747_v57  ;;  %s513_s7 = sshll.u32 %s921_s23, 3 }
  0x59   : > { %v265_v1 = vand.u32 127, %v264_v0  ;;  %v316_v2 = vshrl.u32 %v264_v0, 7  ;;  %v256_v11 = vld [vmem:[%s206_s10 + $0x28] sm:$0xff]  ;;  %v257_v15 = vld [vmem:[%s215_s21] sm:$0xff]  ;;  %v259_v17 = vld [vmem:[%s215_s21 + $0x10] sm:$0xff]  ;;  %s242_s6 = scalar_lea.vmem [#allocation8], %s513_s7 }
  0x5a   : > { %v258_v16 = vld [vmem:[%s215_s21 + $0x8] sm:$0xff]  ;;  %v260_v20 = vld [vmem:[%s215_s21 + $0x18] sm:$0xff]  ;;  %v261_v21 = vld [vmem:[%s215_s21 + $0x20] sm:$0xff]  ;;  %v301_v23 = vsub.f32 %v251_v5, %v257_v15  ;;  %v303_v25 = vsub.f32 %v253_v7, %v259_v17  ;;  %s403_s8 = sshll.u32 %s242_s6, 4  ;;  %s516_s18 = sshll.u32 %s734_s15, 7  ;;  %s942_s8 = int_to_ptr.vmem [resolvable:$true] %s403_s8 }
  0x5b   : > { %v268_v3 = vadd.s32 384, %v265_v1  ;;  %v270_v4 = vadd.s32 640, %v265_v1  ;;  %v317_v8 = vsub.s32 0, %v316_v2  ;;  %v321_v12 = vsub.s32 1, %v316_v2  ;;  %v262_v22 = vld [vmem:[%s215_s21 + $0x28] sm:$0xff]  ;;  %s947_s11 = scalar_lea.hbm %s997_s3, %s516_s18  ;;  %s390_s19 = scalar_lea.sflag [#allocation5], %s921_s23 }
  0x5c   : > { %v325_v13 = vsub.s32 2, %v316_v2  ;;  %v329_v14 = vsub.s32 3, %v316_v2  ;;  %v333_v18 = vsub.s32 4, %v316_v2  ;;  %v337_v19 = vsub.s32 5, %v316_v2  ;;  %v263_v26 = vld [vmem:[%s996_s2] sm:$0x3f] }
  0x5d   : > { %vm274_vm0 = vcmp.ge.s32.totalorder %v268_v3, 392  ;;  %vm282_vm1 = vcmp.lt.s32.totalorder %v270_v4, 696  ;;  %v302_v24 = vsub.f32 %v252_v6, %v258_v16  ;;  %vm292_vm2 = vcmp.ne.f32.partialorder %v260_v20, %v260_v20  ;;  %s656_s9 = scalar_lea.vmem %s942_s8, 128  ;;  %p1009_p0 = scmp.ne.s32.totalorder %s1002_s25, 0 }
  0x5e   : > { %vm293_vm3 = vcmp.ne.f32.partialorder %v261_v21, %v261_v21  ;;  %vm294_vm4 = vcmp.ne.f32.partialorder %v262_v22, %v262_v22  ;;  %v304_v27 = vsub.f32 %v254_v9, %v260_v20  ;;  %vm298_vm5 = vmand %vm292_vm2, %vm274_vm0  ;;  %v305_v28 = vsub.f32 %v255_v10, %v261_v21  ;;  %p657_p8 = scmp.ne.s32.totalorder %s942_s8, %s656_s9  ;;  %s748_s30 = smov [#allocation8]  }
  0x5f   : > { %v306_v29 = vsub.f32 %v256_v11, %v262_v22  ;;  %v318_v30 = vrot.slane %v263_v26, %v317_v8  ;;  %v322_v31 = vrot.slane %v263_v26, %v321_v12  ;;  %vm300_vm6 = vmand %vm294_vm4, %vm282_vm1  ;;  %v326_v33 = vrot.slane %v263_v26, %v325_v13  ;;  %v313_v1 = vld [vmem:[#allocation2] sm:$0x1]  ;;  %s660_s15 = sshll.u32 %s748_s30, 4  ;;  %s661_s15 = int_to_ptr.vmem [resolvable:$false] %s660_s15 }
  0x60   : > { %v310_v32 = vsel %vm298_vm5, 0.0, %v304_v27  ;;  %v330_v34 = vrot.slane %v263_v26, %v329_v14  ;;  %v334_v35 = vrot.slane %v263_v26, %v333_v18  ;;  %v311_v36 = vsel %vm293_vm3, 0.0, %v305_v28  ;;  %p658_p11 = pnand %p657_p8, %p1009_p0  ;;  %s662_s10 = scalar_lea.vmem %s661_s15, 256 }
  0x61   : > { %v345_v37 = vmul.f32 %v318_v30, %v301_v23  ;;  %v338_v38 = vrot.slane %v263_v26, %v337_v19  ;;  %v346_v39 = vmul.f32 %v322_v31, %v302_v24  ;;  %v347_v40 = vmul.f32 %v326_v33, %v303_v25  ;;  %p663_p7 = scmp.lt.s32.totalorder %s942_s8, %s661_s15  ;;  %p664_p10 = scmp.lt.s32.totalorder %s662_s10, %s656_s9 }
  0x62   : > { %v348_v41 = vmul.f32 %v330_v34, %v310_v32  ;;  %v312_v42 = vsel %vm300_vm6, 0.0, %v306_v29  ;;  %v349_v44 = vmul.f32 %v334_v35, %v311_v36  ;;  %p659_p6 = pneg %p658_p11 }
  0x63   : > { %v351_v43 = vmul.f32 %v345_v37, %v301_v23  ;;  %v352_v45 = vmul.f32 %v346_v39, %v302_v24  ;;  %v353_v46 = vmul.f32 %v347_v40, %v303_v25  ;;  %v350_v47 = vmul.f32 %v338_v38, %v312_v42  ;;  %p665_p12 = por %p664_p10, %p663_p7 }
  0x64   : > { %v354_v48 = vmul.f32 %v348_v41, %v310_v32  ;;  %v355_v50 = vmul.f32 %v349_v44, %v311_v36 }
  0x65   : > { %v357_v49 = vadd.f32 %v352_v45, %v351_v43  ;;  %v356_v52 = vmul.f32 %v350_v47, %v312_v42  ;;  %p666_p9 = pnand %p665_p12, %p659_p6 }
  0x67   : > { %v358_v51 = vadd.f32 %v357_v49, %v353_v46 }
  0x69   : > { %v359_v53 = vadd.f32 %v358_v51, %v354_v48 }
  0x6b   : > { %v360_v54 = vadd.f32 %v359_v53, %v355_v50 }
  0x6d   : > { %v361_v55 = vadd.f32 %v360_v54, %v356_v52 }
  0x6f   : > { %362 = vadd.xlane.f32.xlu0 %v361_v55 }
  0xfc   : > { %v363_v58 = vpop.xlane.xlu0 %362 }
  0xfd   : > { %v364_v59 = vrot.slane %v363_v58, 4 }
  0xff   : > { %v365_v60 = vadd.f32 %v364_v59, %v363_v58 }
 0x101   : > { %v366_v61 = vrot.slane %v365_v60, 2 }
 0x103   : > { %v367_v62 = vadd.f32 %v366_v61, %v365_v60 }
 0x105   : > { %v368_v63 = vrot.slane %v367_v62, 1 }
 0x107   : > { %v369_v0 = vadd.f32 %v368_v63, %v367_v62 }
 0x109   : > { %524 = vpush %v369_v0 }
 0x13a   : > { %s525_s5 = spop %524 }
 0x13b   : > { %v371_v2 = vstv %s525_s5 }
 0x13c   : > { %v372_v3 = vadd.f32 %v371_v2, %v313_v1 }
 0x13e   : > { %374 = vst.msk [vmem:[#allocation2] sm:$0x1] %vm249_vm7, %v372_v3 }
 0x145   : > { %v514_v4 = vld [vmem:[#allocation2] ss:$0 sm:$0xff] }
 0x146   : > { %385 = vperm.xlu0 %595, %v514_v4  }
 0x1c5   : > { %v386_v5 = vpop.permute.xlu0 %385 }
 0x1c6   : > { %388 = vst [vmem:[%s242_s6] sm:$0xff] %v386_v5 }
 0x1c7   : > { %669 = shalt.err (!%p666_p9)
}
 0x1c8   : > { %s670_s23 = scalar_lea.hbm %s947_s11, 128  ;;  %s674_s24 = scalar_lea.hbm %s997_s3, 256 }
 0x1c9   : > { %p671_p1 = scmp.ne.s32.totalorder %s947_s11, %s670_s23  ;;  %p675_p4 = scmp.lt.u32.totalorder %s947_s11, %s997_s3 }
 0x1ca   : > { %p676_p13 = scmp.lt.u32.totalorder %s674_s24, %s670_s23  ;;  %p678_p8 = scmp.lt.u32.totalorder %s670_s23, %s947_s11 }
 0x1cb   : > { %p672_p5 = pnand %p671_p1, %p1009_p0 }
 0x1cc   : > { %p677_p3 = por %p676_p13, %p675_p4 }
 0x1cd   : > { %p673_p2 = pneg %p672_p5 }
 0x1ce   : > { %p679_p11 = por %p678_p8, %p677_p3 }
 0x1d0   : > { %p680_p6 = pnand %p679_p11, %p673_p2 }
 0x1d2   : > { %683 = shalt.err (!%p680_p6)
}
 0x1d3   : > { %530 = dma.vmem_to_hbm [thread:$0]  (%p1009_p0), %s942_s8, 128, %s947_s11, %s390_s19  }
 0x1d4 PF: > { %s415_s7 = sand.u32 1, %s722_s12   ;;  %p1010_p7 = scmp.ne.s32.totalorder %s1003_s27, 0 }
 0x1d5   : > { %p1011_p10 = scmp.ge.s32.totalorder %s742_s17, 2  ;;  %s416_s6 = scalar_lea.sflag [#allocation5], %s415_s7 }
 0x1d7   : > { %p540_p12 = pnand %p1011_p10, %p1010_p7 }
 0x1d9   : > { %717 = dma.done.wait (!%p540_p12), %s416_s6, 128  }
 0x1da   : > { %719 = vsyncadd (!%p540_p12), %s416_s6, 4294967168  ;;  %s22_s17 = sadd.s32 1, %s742_s17   ;;  %s1012_s12 = smov %s726_s13 }
 0x1db   : > { %p19_p9 = scmp.ge.s32.totalorder %s22_s17, 4   ;;  %s1013_s13 = smov %s730_s14 }
 0x1dc   : > { %s1014_s14 = smov %s825_s26  ;;  %s1015_s15 = smov %s738_s16 }
 0x1dd   : > { %s1016_s16 = smov %s1018_s20  ;;  %21 = sbr.rel (!%p19_p9) target bundleno = 8 (0x8), region = 98 }
 0x1e4   :  { %421 = vsyncpa [#allocation4], 1 }
 0x1e5   :  { %423 = vsyncpa [#allocation4 + $0x1], 1 }
 0x1e6   :  { %424 = vsyncpa [#allocation7], 1 }
 0x1e7   :  { %426 = vsyncpa [#allocation7 + $0x1], 1 }
 0x1e8   :  { %427 = vsyncpa [#allocation5], 1 }
 0x1e9   :  { %429 = vsyncpa [#allocation5 + $0x1], 1 }

</bundles_post_ra>
